<compile_context>
chip_gen: v7x
topology: tpu7x:2x2x1
jax: 0.10.0
libtpu: 0.0.40
codegen_flags: <defaults>
</compile_context>

<pallas_src>
import functools

import jax
import jax.numpy as jnp
from jax import lax
from jax.experimental import pallas as pl
from jax.experimental.pallas import tpu as pltpu

LANES = 128
ACC_ROWS = 64            # accumulator height: 8 vregs -> parallel add chains
MAX_BLOCK_ROWS = 8192    # 8192 * 128 * 4 B = 4 MiB per input block (f32)
VMEM_LIMIT_BYTES = 48 * 1024 * 1024


def _cdiv(a, b):
    return -(-a // b)


def _round_up(x, m):
    return _cdiv(x, m) * m


def _focal_terms(x, t, alpha, gamma):
    """Per-element focal-loss terms in plain JAX (reference + ragged tail)."""
    x = x.astype(jnp.float32)
    t = t.astype(jnp.float32)
    bce = jnp.maximum(x, 0.0) - x * t + jnp.log1p(jnp.exp(-jnp.abs(x)))
    pt = jnp.exp(-bce)
    return alpha * (1.0 - pt) ** gamma * bce


def _focal_loss_kernel(x_ref, t_ref, o_ref, *, alpha, gamma, rows_valid,
                       block_rows, blocks_per_core, acc_rows, needs_mask):
    c = pl.program_id(0)   # TensorCore split ("parallel", used on v7x megacore)
    i = pl.program_id(1)   # reduction steps ("arbitrary")

    # The output block index is constant along axis 1, so o_ref stays resident
    # in VMEM across the whole per-core reduction: use it as the accumulator.
    @pl.when(i == 0)
    def _():
        o_ref[...] = jnp.zeros_like(o_ref)

    x = x_ref[...].astype(jnp.float32)
    t = t_ref[...].astype(jnp.float32)

    # Numerically stable BCE-with-logits (matches torch, reduction='none'):
    #   max(x, 0) - x*t + log1p(exp(-|x|))
    # TODO(synk): for guaranteed-binary targets a 2-transcendental variant
    # (sigmoid built from one exp + approx reciprocal) would trim the EUP path
    # on v7x; the general soft-target formula is kept here.
    exp_neg_abs = jnp.exp(-jnp.abs(x))
    bce = jnp.maximum(x, 0.0) - x * t + jnp.log1p(exp_neg_abs)
    pt = jnp.exp(-bce)
    one_minus_pt = 1.0 - pt

    # Avoid the float `** gamma` (exp/log on the EUP) for common gammas.
    if gamma == 2.0:
        focal_w = one_minus_pt * one_minus_pt
    elif gamma == 1.0:
        focal_w = one_minus_pt
    elif gamma == 0.0:
        focal_w = None
    elif float(gamma).is_integer() and gamma > 0:
        focal_w = lax.integer_pow(one_minus_pt, int(gamma))
    else:
        focal_w = one_minus_pt ** gamma
    f_loss = bce if focal_w is None else focal_w * bce
    if alpha != 1.0:
        f_loss = alpha * f_loss

    # Only the globally last block can be partial; its out-of-bounds rows hold
    # stale VMEM data.  Select (not multiply) so garbage NaN/Inf is discarded.
    if needs_mask:
        row0 = (c * blocks_per_core + i) * block_rows
        row_ids = row0 + lax.broadcasted_iota(jnp.int32, f_loss.shape, 0)
        f_loss = jnp.where(row_ids < rows_valid, f_loss, 0.0)

    # Partial-reduce the (block_rows, 128) tile to (acc_rows, 128) with pure
    # VPU adds; the final cross-lane reduce runs in XLA on a tiny slab.
    o_ref[...] += jnp.sum(
        f_loss.reshape(block_rows // acc_rows, acc_rows, LANES), axis=0
    )


def _plan_grid(rows):
    """Pick (num_cores, blocks_per_core, block_rows, acc_rows) for `rows` full
    128-lane rows, guaranteeing:
      * block_rows % acc_rows == 0 and block_rows <= rows
      * full coverage, and every block overlaps >= 1 valid row
        (so no DMA block is ever fully out of bounds).
    """
    if rows < 8:
        return 1, 1, rows, rows
    acc_rows = ACC_ROWS if rows >= ACC_ROWS else 8

    def ok(nb, br):
        return (br >= acc_rows and br % acc_rows == 0 and br <= rows
                and nb * br >= rows and (nb - 1) * br < rows)

    # Prefer splitting the blocks across 2 TensorCores (v7x megacore); on
    # single-TC chips (v5e/v6e) the extra leading grid axis is harmless.
    for num_cores in (2, 1):
        nb = _round_up(max(num_cores, _cdiv(rows, MAX_BLOCK_ROWS)), num_cores)
        # Evenly-sized blocks (keeps the masked tail of the last block small).
        br = _round_up(_cdiv(rows, nb), acc_rows)
        if ok(nb, br):
            return num_cores, nb // num_cores, br, acc_rows
        # Maximal blocks.
        br = min(MAX_BLOCK_ROWS, (rows // acc_rows) * acc_rows)
        nb = _round_up(_cdiv(rows, br), num_cores)
        if ok(nb, br):
            return num_cores, nb // num_cores, br, acc_rows
    # Always-valid fallback: single core, one accumulator-height block each.
    return 1, _cdiv(rows, acc_rows), acc_rows, acc_rows


def focal_loss(inputs, targets, alpha=1.0, gamma=2.0, reduction="mean"):
    """Pallas TPU focal loss (forward), matching the PyTorch FocalLoss module.

    Targets may be any dtype (f32/bf16/int8, cast to f32 in-kernel), so callers
    can halve the targets HBM stream without an extra wrapper-side astype pass.
    """
    assert inputs.shape == targets.shape
    if reduction not in ("mean", "sum"):
        # TODO(synk): reduction='none' needs the full per-element map returned;
        # only the in-kernel reduced variants are implemented here.
        raise NotImplementedError("reduction='none' not implemented in this kernel")

    alpha = float(alpha)
    gamma = float(gamma)
    n = int(inputs.size)
    x = inputs.reshape(-1)
    t = targets.reshape(-1)

    rows = n // LANES          # full 128-lane rows handled by the kernel
    rem = n - rows * LANES     # <128-element ragged tail handled in plain JAX

    total = jnp.zeros((), jnp.float32)
    if rem:
        # Tiny tail (under one lane row) in plain JAX -- this replaces the old
        # full-array jnp.pad (a complete HBM read+write of both inputs).
        total = total + jnp.sum(
            _focal_terms(x[rows * LANES:], t[rows * LANES:], alpha, gamma))

    if rows:
        if rem:
            # TODO(synk): for n % 128 != 0 this bulk slice+reshape may still
            # cost one copy; a fully copy-free ragged path needs manual DMA
            # from the flat HBM buffer.
            x2 = x[: rows * LANES].reshape(rows, LANES)
            t2 = t[: rows * LANES].reshape(rows, LANES)
        else:
            x2 = x.reshape(rows, LANES)   # contiguous reshape: no copy
            t2 = t.reshape(rows, LANES)

        num_cores, blocks_per_core, block_rows, acc_rows = _plan_grid(rows)
        needs_mask = num_cores * blocks_per_core * block_rows != rows

        kernel = functools.partial(
            _focal_loss_kernel,
            alpha=alpha, gamma=gamma, rows_valid=rows, block_rows=block_rows,
            blocks_per_core=blocks_per_core, acc_rows=acc_rows,
            needs_mask=needs_mask,
        )
        in_map = lambda c, i: (c * blocks_per_core + i, 0)

        partials = pl.pallas_call(
            kernel,
            out_shape=jax.ShapeDtypeStruct((num_cores * acc_rows, LANES),
                                           jnp.float32),
            grid_spec=pltpu.PrefetchScalarGridSpec(
                num_scalar_prefetch=0,
                grid=(num_cores, blocks_per_core),
                in_specs=[pl.BlockSpec((block_rows, LANES), in_map),
                          pl.BlockSpec((block_rows, LANES), in_map)],
                out_specs=pl.BlockSpec((acc_rows, LANES), lambda c, i: (c, 0)),
            ),
            compiler_params=pltpu.CompilerParams(
                dimension_semantics=("parallel", "arbitrary"),
                vmem_limit_bytes=VMEM_LIMIT_BYTES,
            ),
        )(x2, t2)
        total = total + jnp.sum(partials)

    if reduction == "mean":
        total = total / float(n)
    return total


if __name__ == "__main__":
    key = jax.random.PRNGKey(0)
    k1, k2, k3, k4 = jax.random.split(key, 4)

    # NCHW-like logits and {0,1} targets; 2048 elements = 128-aligned, no copies.
    x = jax.random.normal(k1, (2, 4, 16, 16), dtype=jnp.float32)
    t = (jax.random.uniform(k2, (2, 4, 16, 16)) > 0.5).astype(jnp.float32)
    out_mean = jax.block_until_ready(
        focal_loss(x, t, alpha=1.0, gamma=2.0, reduction="mean"))
    ref_mean = jnp.mean(_focal_terms(x, t, 1.0, 2.0))
    assert jnp.allclose(out_mean, ref_mean, rtol=1e-5, atol=1e-6), (out_mean, ref_mean)

    # Ragged size (4551 = 35*128 + 71): exercises the in-kernel row mask, the
    # dual-core grid split and the plain-JAX tail, with alpha=0.5 / 'sum'.
    x2 = jax.random.normal(k3, (3, 37, 41), dtype=jnp.float32)
    t2 = (jax.random.uniform(k4, (3, 37, 41)) > 0.5).astype(jnp.float32)
    out_sum = jax.block_until_ready(
        focal_loss(x2, t2, alpha=0.5, gamma=2.0, reduction="sum"))
    ref_sum = jnp.sum(_focal_terms(x2, t2, 0.5, 2.0))
    assert jnp.allclose(out_sum, ref_sum, rtol=1e-5, atol=1e-6), (out_sum, ref_sum)

    print("KERNEL_OK")
</pallas_src>

<mosaic_0001>
module attributes {stable_mosaic.version = 11 : i64} {
  func.func @_focal_loss_kernel(%arg0: i32, %arg1: i32, %arg2: memref<8x128xf32, #tpu.memory_space<vmem>>, %arg3: memref<8x128xf32, #tpu.memory_space<vmem>>, %arg4: memref<8x128xf32, #tpu.memory_space<vmem>>) attributes {dimension_semantics = [#tpu.dimension_semantics<parallel>, #tpu.dimension_semantics<arbitrary>], iteration_bounds = array<i64: 2, 1>, scalar_prefetch = 0 : i64, scratch_operands = 0 : i64, tpu.core_type = #tpu.core_type<tc>, window_params = [{transform_indices = @transform_0, window_bounds = array<i64: 8, 128>}, {transform_indices = @transform_1, window_bounds = array<i64: 8, 128>}, {transform_indices = @transform_2, window_bounds = array<i64: 8, 128>}]} {
    %c0_i32 = arith.constant 0 : i32
    %0 = arith.cmpi eq, %arg1, %c0_i32 : i32
    %1 = arith.extui %0 : i1 to i32
    %c0_i32_0 = arith.constant 0 : i32
    %2 = arith.cmpi ne, %1, %c0_i32_0 : i32
    scf.if %2 {
      %cst_12 = arith.constant 0.000000e+00 : f32
      %27 = vector.broadcast %cst_12 : f32 to vector<8x128xf32>
      %c0_13 = arith.constant 0 : index
      %c0_14 = arith.constant 0 : index
      %28 = vector.load %arg4[%c0_13, %c0_14] : memref<8x128xf32, #tpu.memory_space<vmem>>, vector<8x128xf32>
      tpu.vector_store %arg4[%c0_13, %c0_14], %27 {strides = array<i32>} : memref<8x128xf32, #tpu.memory_space<vmem>>, vector<8x128xf32>,
    } else {
    }
    %c0 = arith.constant 0 : index
    %c0_1 = arith.constant 0 : index
    %3 = vector.load %arg2[%c0, %c0_1] : memref<8x128xf32, #tpu.memory_space<vmem>>, vector<8x128xf32>
    %c0_2 = arith.constant 0 : index
    %c0_3 = arith.constant 0 : index
    %4 = vector.load %arg3[%c0_2, %c0_3] : memref<8x128xf32, #tpu.memory_space<vmem>>, vector<8x128xf32>
    %5 = math.absf %3 : vector<8x128xf32>
    %cst = arith.constant 0.000000e+00 : f32
    %6 = vector.broadcast %cst : f32 to vector<8x128xf32>
    %7 = arith.subf %6, %5 : vector<8x128xf32>
    %8 = math.exp %7 : vector<8x128xf32>
    %cst_4 = arith.constant 0.000000e+00 : f32
    %9 = vector.broadcast %cst_4 : f32 to vector<8x128xf32>
    %10 = arith.maximumf %3, %9 : vector<8x128xf32>
    %11 = arith.mulf %3, %4 : vector<8x128xf32>
    %12 = arith.subf %10, %11 : vector<8x128xf32>
    %13 = math.log1p %8 : vector<8x128xf32>
    %14 = arith.addf %12, %13 : vector<8x128xf32>
    %cst_5 = arith.constant 0.000000e+00 : f32
    %15 = vector.broadcast %cst_5 : f32 to vector<8x128xf32>
    %16 = arith.subf %15, %14 : vector<8x128xf32>
    %17 = math.exp %16 : vector<8x128xf32>
    %cst_6 = arith.constant 1.000000e+00 : f32
    %18 = vector.broadcast %cst_6 : f32 to vector<8x128xf32>
    %19 = arith.subf %18, %17 : vector<8x128xf32>
    %20 = arith.mulf %19, %19 : vector<8x128xf32>
    %21 = arith.mulf %20, %14 : vector<8x128xf32>
    %c0_7 = arith.constant 0 : index
    %c0_8 = arith.constant 0 : index
    %22 = vector.load %arg4[%c0_7, %c0_8] : memref<8x128xf32, #tpu.memory_space<vmem>>, vector<8x128xf32>
    %23 = vector.shape_cast %21 : vector<8x128xf32> to vector<1x8x128xf32>
    %cst_9 = arith.constant dense<0.000000e+00> : vector<8x128xf32>
    %24 = vector.multi_reduction <add>, %23, %cst_9 [0] : vector<1x8x128xf32> to vector<8x128xf32>
    %25 = arith.addf %22, %24 : vector<8x128xf32>
    %c0_10 = arith.constant 0 : index
    %c0_11 = arith.constant 0 : index
    %26 = vector.load %arg4[%c0_10, %c0_11] : memref<8x128xf32, #tpu.memory_space<vmem>>, vector<8x128xf32>
    tpu.vector_store %arg4[%c0_10, %c0_11], %25 {strides = array<i32>} : memref<8x128xf32, #tpu.memory_space<vmem>>, vector<8x128xf32>,
    return
  }
  func.func @transform_0(%arg0: i32, %arg1: i32) -> (i32, i32) {
    %c1_i32 = arith.constant 1 : i32
    %0 = arith.muli %arg0, %c1_i32 : i32
    %1 = arith.addi %0, %arg1 : i32
    %c0_i32 = arith.constant 0 : i32
    %c0_i32_0 = arith.constant 0 : i32
    return %1, %c0_i32 : i32, i32
  }
  func.func @transform_1(%arg0: i32, %arg1: i32) -> (i32, i32) {
    %c1_i32 = arith.constant 1 : i32
    %0 = arith.muli %arg0, %c1_i32 : i32
    %1 = arith.addi %0, %arg1 : i32
    %c0_i32 = arith.constant 0 : i32
    %c0_i32_0 = arith.constant 0 : i32
    return %1, %c0_i32 : i32, i32
  }
  func.func @transform_2(%arg0: i32, %arg1: i32) -> (i32, i32) {
    %c0_i32 = arith.constant 0 : i32
    %c0_i32_0 = arith.constant 0 : i32
    return %arg0, %c0_i32 : i32, i32
  }
}

</mosaic_0001>

<bundles_post_ra>
// kernel: tpu_custom_call.1
= control target key start
LH: loop header
LB: loop body
LE: loop exit
PB: predicated region body
PF: predicated region fallthrough
CT: control target
= control target key end

     0   :  { %7 = vsyncpa [#allocation3], 0  ;;  %s848_s0 = inlined_call_operand.hbm [shape: f32[16,128], index: 0, kind: input, shape index: {}]   ;;  %s849_s1 = inlined_call_operand.hbm [shape: f32[16,128], index: 1, kind: input, shape index: {}]   ;;  %s850_s2 = inlined_call_operand.hbm [shape: f32[16,128], index: 2, kind: output, shape index: {}]  }
   0x1   :  { %9 = vsyncpa [#allocation3 + $0x1], 0 }
   0x2   :  { %10 = vsyncpa [#allocation6], 0 }
   0x3   :  { %12 = vsyncpa [#allocation6 + $0x1], 0 }
   0x4   :  { %13 = vsyncpa [#allocation4], 0 }
   0x5   :  { %15 = vsyncpa [#allocation4 + $0x1], 0  ;;  %s623_s9 = smov 0   ;;  %s625_s10 = smov 0  }
   0x6   :  { %s627_s11 = smov 0   ;;  %s629_s12 = smov 0  }
   0x7   :  { %s631_s13 = smov 0   ;;  %s633_s14 = smov 0  }
   0x8 LB: > { %s367_s15 = sadd.s32 4294967295, %s603_s14   ;;  %s368_s16 = sadd.s32 4294967294, %s603_s14   ;;  %s603_s14 = sphi %s633_s14, %s21_s14   ;;  %s599_s13 = sphi %s631_s13, %s870_s13   ;;  %s595_s12 = sphi %s629_s12, %s869_s12   ;;  %s591_s11 = sphi %s627_s11, %s868_s11   ;;  %s587_s10 = sphi %s625_s10, %s867_s10   ;;  %s583_s9 = sphi %s623_s9, %s866_s9  }
   0x9   : > { %s33_s17 = sadd.s32 1, %s599_s13  ;;  %s42_s18 = sadd.s32 1, %s591_s11 }
   0xa   : > { %p35_p0 = scmp.ge.s32.totalorder %s33_s17, 2  ;;  %p49_p1 = scmp.ne.s32.totalorder %s591_s11, %s587_s10 }
   0xb   : > { %p50_p2 = scmp.eq.s32.totalorder %s603_s14, 0  ;;  %p55_p3 = scmp.ne.s32.totalorder %s587_s10, %s583_s9 }
   0xc   : > { %s872_s17 = smov (%p35_p0, %s33_s17), 0  ;;  %p56_p5 = scmp.eq.s32.totalorder %s367_s15, 0 }
   0xd   : > { %p664_p4 = por %p50_p2, %p49_p1  ;;  %s39_s20 = ssub.s32 %s599_s13, %s872_s17 }
   0xe   : > { %p107_p6 = scmp.eq.s32.totalorder %s367_s15, 1  ;;  %p40_p7 = scmp.eq.s32.totalorder %s39_s20, 0 }
   0xf   : > { %p670_p8 = por %p56_p5, %p55_p3  ;;  %p113_p10 = scmp.eq.s32.totalorder %s368_s16, 1 }
  0x10   : > { %p674_p9 = por %p107_p6, %p49_p1  ;;  %p400_p13 = scmp.lt.s32.totalorder %s603_s14, 2 }
  0x11   : > { %s854_s21 = scalar_select %p670_p8, 1, 0 }
  0x12   : > { %s855_s22 = scalar_select %p674_p9, 1, 0 }
  0x13   : > { %s679_s23 = scalar_select %p40_p7, %s591_s11, %s42_s18  }
  0x14   : > { %p681_p11 = por %p113_p10, %p55_p3  ;;  %s688_s25 = sand.u32 1, %s591_s11  }
  0x15   : > { %s371_s26 = sshll.u32 %s688_s25, 3  ;;  %s372_s27 = sshll.u32 %s599_s13, 7 }
  0x16   : > { %s856_s24 = scalar_select %p681_p11, 1, 0 }
  0x17   : > { %s697_s30 = scalar_lea.hbm %s848_s0, %s372_s27  ;;  %s137_s3 = scalar_lea.vmem [#allocation2], %s371_s26 }
  0x18   : > { %s145_s4 = sshll.u32 %s137_s3, 4  ;;  %p705_p0 = pnand %p400_p13, %p664_p4  ;;  %s701_s4 = int_to_ptr.vmem [resolvable:$true] %s145_s4 }
  0x19   : > { %s134_s6 = scalar_lea.sflag [#allocation3], %s688_s25  ;;  %s457_s7 = scalar_lea.hbm %s697_s30, 128 }
  0x1a   : > { %p458_p3 = scmp.ne.s32.totalorder %s697_s30, %s457_s7  ;;  %p459_p5 = pneg %p705_p0 }
  0x1b   : > { %s462_s16 = scalar_lea.hbm %s848_s0, 256  ;;  %p463_p4 = scmp.lt.u32.totalorder %s697_s30, %s848_s0 }
  0x1c   : > { %p460_p6 = pnand %p459_p5, %p458_p3  ;;  %p464_p10 = scmp.lt.u32.totalorder %s462_s16, %s457_s7 }
  0x1d   : > { %p466_p12 = scmp.lt.u32.totalorder %s457_s7, %s697_s30 }
  0x1e   : > { %p461_p7 = pneg %p460_p6  ;;  %p465_p13 = por %p464_p10, %p463_p4 }
  0x20   : > { %p467_p1 = por %p466_p12, %p465_p13 }
  0x22   : > { %p468_p2 = pnand %p467_p1, %p461_p7 }
  0x24   : > { %471 = shalt.err (!%p468_p2)
}
  0x25   : > { %s472_s20 = scalar_lea.vmem %s701_s4, 128  ;;  %s605_s28 = smov [#allocation2]  }
  0x26   : > { %p473_p3 = scmp.ne.s32.totalorder %s701_s4, %s472_s20  ;;  %s477_s29 = sshll.u32 %s605_s28, 4  ;;  %s478_s29 = int_to_ptr.vmem [resolvable:$false] %s477_s29 }
  0x27   : > { %s479_s3 = scalar_lea.vmem %s478_s29, 256  ;;  %p480_p9 = scmp.lt.s32.totalorder %s701_s4, %s478_s29 }
  0x28   : > { %p475_p6 = pnand %p473_p3, %p459_p5  ;;  %p481_p4 = scmp.lt.s32.totalorder %s479_s3, %s472_s20 }
  0x2a   : > { %p476_p11 = pneg %p475_p6  ;;  %p482_p10 = por %p481_p4, %p480_p9 }
  0x2c   : > { %p483_p12 = pnand %p482_p10, %p476_p11 }
  0x2e   : > { %486 = shalt.err (!%p483_p12)
}
  0x2f   : > { %392 = dma.hbm_to_vmem [thread:$0]  (!%p705_p0), %s697_s30, 128, %s701_s4, %s134_s6  }
  0x30   : > { %p858_p1 = scmp.lt.s32.totalorder %s603_s14, 3  ;;  %p859_p2 = scmp.ge.s32.totalorder %s603_s14, 1 }
  0x31   : > { %s750_s16 = scalar_lea.hbm %s849_s1, %s372_s27  ;;  %s156_s18 = scalar_lea.vmem [#allocation5], %s371_s26 }
  0x32   : > { %p741_p7 = pnand %p859_p2, %p858_p1  ;;  %s164_s19 = sshll.u32 %s156_s18, 4  ;;  %s165_s19 = int_to_ptr.vmem [resolvable:$true] %s164_s19 }
  0x33   : > { %s153_s30 = scalar_lea.sflag [#allocation6], %s688_s25  ;;  %s487_s4 = scalar_lea.hbm %s750_s16, 128 }
  0x34   : > { %s860_s7 = scalar_select %p741_p7, 1, 0 }
  0x35   : > { %p488_p9 = scmp.ne.s32.totalorder %s750_s16, %s487_s4  ;;  %s492_s27 = scalar_lea.hbm %s849_s1, 256 }
  0x36   : > { %p493_p3 = scmp.lt.u32.totalorder %s750_s16, %s849_s1  ;;  %p494_p6 = scmp.lt.u32.totalorder %s492_s27, %s487_s4 }
  0x37   : > { %p490_p11 = pnand %p488_p9, %p459_p5  ;;  %p496_p10 = scmp.lt.u32.totalorder %s487_s4, %s750_s16 }
  0x38   : > { %p495_p4 = por %p494_p6, %p493_p3 }
  0x39   : > { %p491_p13 = pneg %p490_p11 }
  0x3a   : > { %p497_p12 = por %p496_p10, %p495_p4 }
  0x3c   : > { %p498_p1 = pnand %p497_p12, %p491_p13 }
  0x3e   : > { %501 = shalt.err (!%p498_p1)
}
  0x3f   : > { %s502_s25 = scalar_lea.vmem %s165_s19, 128  ;;  %s606_s26 = smov [#allocation5]  }
  0x40   : > { %p503_p2 = scmp.ne.s32.totalorder %s165_s19, %s502_s25  ;;  %s507_s3 = sshll.u32 %s606_s26, 4  ;;  %s508_s3 = int_to_ptr.vmem [resolvable:$false] %s507_s3 }
  0x41   : > { %s509_s8 = scalar_lea.vmem %s508_s3, 256  ;;  %p510_p8 = scmp.lt.s32.totalorder %s165_s19, %s508_s3 }
  0x42   : > { %p505_p9 = pnand %p503_p2, %p459_p5  ;;  %p511_p7 = scmp.lt.s32.totalorder %s509_s8, %s502_s25 }
  0x44   : > { %p506_p11 = pneg %p505_p9  ;;  %p512_p3 = por %p511_p7, %p510_p8 }
  0x46   : > { %p513_p6 = pnand %p512_p3, %p506_p11 }
  0x48   : > { %516 = shalt.err (!%p513_p6)
}
  0x49   : > { %395 = dma.hbm_to_vmem [thread:$0]  (!%p705_p0), %s750_s16, 128, %s165_s19, %s153_s30  }
  0x4a   : > { %p861_p13 = scmp.ne.s32.totalorder %s860_s7, 0 }
  0x4b   : > { %s777_s15 = sand.u32 (!%p861_p13), 1, %s587_s10   ;;  %p862_p8 = scmp.ne.s32.totalorder (!%p861_p13), %s854_s21, 0 }
  0x4c   : > { %173 = sbr.rel (%p861_p13) target bundleno = 157 (0x9d), region = 28  ;;  %s780_s18 = sshll.u32 (!%p861_p13), %s777_s15, 3 }
  0x4d   : > { %s176_s4 = scalar_lea.sflag (!%p861_p13), [#allocation3], %s777_s15  ;;  %s179_s6 = scalar_lea.vmem (!%p861_p13), [#allocation2], %s780_s18 }
  0x53   : > { %570 = dma.done.wait (%p862_p8), %s176_s4, 128  }
  0x54   : > { %572 = vsyncadd (%p862_p8), %s176_s4, 4294967168  ;;  %s185_s5 = scalar_lea.sflag [#allocation6], %s777_s15  ;;  %s188_s7 = scalar_lea.vmem [#allocation5], %s780_s18 }
  0x55   : > { %574 = dma.done.wait (%p862_p8), %s185_s5, 128  }
  0x56   : > { %576 = vsyncadd (%p862_p8), %s185_s5, 4294967168  ;;  %v221_v0 = vld [vmem:[%s179_s6] sm:$0xff]  ;;  %v222_v7 = vld [vmem:[%s188_s7] sm:$0xff]  ;;  %s380_s21 = sshll.u32 %s595_s12, 7  ;;  %s213_s16 = scalar_lea.vmem [#allocation7], %s780_s18 }
  0x57   : > { %v223_v1 = vand.u32 2147483647, %v221_v0  ;;  %v227_v9 = vmax.f32 %v221_v0, 0.0  ;;  %v228_v10 = vmul.f32 %v222_v7, %v221_v0  ;;  %s264_s19 = sshll.u32 %s213_s16, 4  ;;  %s799_s27 = scalar_lea.hbm %s850_s2, %s380_s21  ;;  %s801_s19 = int_to_ptr.vmem [resolvable:$true] %s264_s19 }
  0x58   : > { %s251_s28 = scalar_lea.sflag [#allocation4], %s777_s15  ;;  %s517_s29 = scalar_lea.vmem %s801_s19, 128 }
  0x59   : > { %v224_v2 = vsub.f32 0.0, %v223_v1  ;;  %v229_v14 = vsub.f32 %v227_v9, %v228_v10  ;;  %p518_p0 = scmp.ne.s32.totalorder %s801_s19, %s517_s29  ;;  %p863_p5 = scmp.ne.s32.totalorder %s855_s22, 0 }
  0x5a   : > { %s607_s12 = smov [#allocation7]  }
  0x5b   : > { %v225_v3 = vmul.f32 1.442695, %v224_v2  ;;  %p519_p7 = pnand %p518_p0, %p863_p5  ;;  %s521_s25 = sshll.u32 %s607_s12, 4  ;;  %s522_s25 = int_to_ptr.vmem [resolvable:$false] %s521_s25 }
  0x5c   : > { %s523_s26 = scalar_lea.vmem %s522_s25, 256  ;;  %p524_p10 = scmp.lt.s32.totalorder %s801_s19, %s522_s25 }
  0x5d   : > { %451 = vpow2.f32 %v225_v3  ;;  %p520_p4 = pneg %p519_p7  ;;  %p525_p12 = scmp.lt.s32.totalorder %s523_s26, %s517_s29 }
  0x5f   : > { %p526_p1 = por %p525_p12, %p524_p10 }
  0x61   : > { %p527_p2 = pnand %p526_p1, %p520_p4 }
  0x67   : > { %v452_v4 = vpop.eup %451 }
  0x68   : > { %v230_v5 = vadd.f32 1.0, %v452_v4  ;;  %v233_v6 = vmul.f32 -0.5, %v452_v4  ;;  %v236_v11 = vand.u32 2147483647, %v452_v4 }
  0x6a   : > { %453 = vlog2.f32 %v230_v5  ;;  %v234_v8 = vadd.f32 1.0, %v233_v6  ;;  %vm237_vm0 = vcmp.lt.f32.partialorder %v236_v11, 0.0004427343 }
  0x6c   : > { %v235_v12 = vmul.f32 %v452_v4, %v234_v8 }
  0x74   : > { %v454_v13 = vpop.eup %453 }
  0x75   : > { %v232_v15 = vmul.f32 0.6931472, %v454_v13 }
  0x77   : > { %v238_v16 = vsel %vm237_vm0, %v235_v12, %v232_v15 }
  0x78   : > { %v239_v17 = vadd.f32 %v238_v16, %v229_v14 }
  0x7a   : > { %v240_v18 = vsub.f32 0.0, %v239_v17 }
  0x7c   : > { %v241_v19 = vmul.f32 1.442695, %v240_v18 }
  0x7e   : > { %455 = vpow2.f32 %v241_v19 }
  0x88   : > { %v456_v20 = vpop.eup %455 }
  0x89   : > { %v243_v21 = vsub.f32 1.0, %v456_v20 }
  0x8b   : > { %v244_v22 = vmul.f32 %v243_v21, %v243_v21 }
  0x8d   : > { %v245_v23 = vmul.f32 %v244_v22, %v239_v17 }
  0x8f   : > { %249 = vst [vmem:[%s213_s16] sm:$0xff] %v245_v23 }
  0x90   : > { %530 = shalt.err (!%p527_p2)
}
  0x91   : > { %s531_s3 = scalar_lea.hbm %s799_s27, 128  ;;  %s535_s18 = scalar_lea.hbm %s850_s2, 256 }
  0x92   : > { %p532_p9 = scmp.ne.s32.totalorder %s799_s27, %s531_s3  ;;  %p536_p6 = scmp.lt.u32.totalorder %s799_s27, %s850_s2 }
  0x93   : > { %p537_p13 = scmp.lt.u32.totalorder %s535_s18, %s531_s3  ;;  %p539_p0 = scmp.lt.u32.totalorder %s531_s3, %s799_s27 }
  0x94   : > { %p533_p11 = pnand %p532_p9, %p863_p5 }
  0x95   : > { %p538_p8 = por %p537_p13, %p536_p6 }
  0x96   : > { %p534_p3 = pneg %p533_p11 }
  0x97   : > { %p540_p7 = por %p539_p0, %p538_p8 }
  0x99   : > { %p541_p4 = pnand %p540_p7, %p534_p3 }
  0x9b   : > { %544 = shalt.err (!%p541_p4)
}
  0x9c   : > { %387 = dma.vmem_to_hbm [thread:$0]  (%p863_p5), %s801_s19, 128, %s799_s27, %s251_s28  }
  0x9d PF: > { %s276_s5 = sand.u32 1, %s583_s9   ;;  %p864_p10 = scmp.ne.s32.totalorder %s856_s24, 0 }
  0x9e   : > { %p865_p12 = scmp.ge.s32.totalorder %s603_s14, 2  ;;  %s277_s7 = scalar_lea.sflag [#allocation4], %s276_s5 }
  0xa0   : > { %p397_p1 = pnand %p865_p12, %p864_p10 }
  0xa2   : > { %578 = dma.done.wait (!%p397_p1), %s277_s7, 128  }
  0xa3   : > { %580 = vsyncadd (!%p397_p1), %s277_s7, 4294967168  ;;  %s21_s14 = sadd.s32 1, %s603_s14   ;;  %s866_s9 = smov %s587_s10 }
  0xa4   : > { %p18_p2 = scmp.ge.s32.totalorder %s21_s14, 4   ;;  %s867_s10 = smov %s591_s11 }
  0xa5   : > { %s868_s11 = smov %s679_s23  ;;  %s869_s12 = smov %s599_s13 }
  0xa6   : > { %s870_s13 = smov %s872_s17  ;;  %20 = sbr.rel (!%p18_p2) target bundleno = 8 (0x8), region = 90 }
  0xad   :  { %282 = vsyncpa [#allocation3], 1 }
  0xae   :  { %284 = vsyncpa [#allocation3 + $0x1], 1 }
  0xaf   :  { %285 = vsyncpa [#allocation6], 1 }
  0xb0   :  { %287 = vsyncpa [#allocation6 + $0x1], 1 }
  0xb1   :  { %288 = vsyncpa [#allocation4], 1 }
  0xb2   :  { %290 = vsyncpa [#allocation4 + $0x1], 1 }

</bundles_post_ra>
